<compile_context>
chip_gen: v5e
topology: v5e:2x2
jax: 0.10.0
libtpu: 0.0.40
codegen_flags: <defaults>
</compile_context>

<pallas_src>
import functools

import jax
import jax.numpy as jnp
from jax import lax
from jax.experimental import pallas as pl
from jax.experimental.pallas import tpu as pltpu

_MAX_TM, _MAX_TN, _MAX_TK = 256, 512, 4096
_VMEM_LIMIT = 48 * 1024 * 1024          # safe on v7x (64 MiB/TC) and v5e/v6e


def _round_up(x, m):
    return (x + m - 1) // m * m


def _pad_to(x, shape):
    """Zero-pad `x` up to `shape` (no-op when already that shape)."""
    pads = [(0, t - s) for s, t in zip(x.shape, shape)]
    if all(p == (0, 0) for p in pads):
        return x
    return jnp.pad(x, pads)


def _apply_act(y, act):
    if act == "leaky_relu":
        return jnp.where(y >= 0, y, 0.2 * y)
    if act == "relu":
        return jnp.maximum(y, 0.0)
    if act == "tanh":
        return jnp.tanh(y)
    return y


def _tile_dims(M, K, N, G):
    Mp = _round_up(max(M, 16), 16)
    tm = min(_MAX_TM, Mp)
    Mp = _round_up(Mp, tm)
    Kp = _round_up(K, 128)
    tk = min(_MAX_TK, Kp)
    Kp = _round_up(Kp, tk)
    Np = _round_up(N, 128)
    tn = min(_MAX_TN, Np)
    # Tiny-M single-group layers (enc4/enc5): expose >= 2 parallel grid points
    # so the second TensorCore on v7x has work.
    if G == 1 and Mp // tm == 1 and Np // tn == 1 and Np >= 256:
        tn = 128 * max(1, (Np // 2) // 128)
    Np = _round_up(Np, tn)
    return Mp, Kp, Np, tm, tk, tn


# ----------------------------------------------------------------------------
# Pallas kernels
# ----------------------------------------------------------------------------
def _gemm_bias_act_kernel(a_ref, b_ref, bias_ref, o_ref, acc_ref, *, act):
    @pl.when(pl.program_id(3) == 0)
    def _():
        acc_ref[...] = jnp.zeros_like(acc_ref)

    acc_ref[...] += jnp.dot(a_ref[...], b_ref[...],
                            preferred_element_type=jnp.float32)

    @pl.when(pl.program_id(3) == pl.num_programs(3) - 1)
    def _():
        y = _apply_act(acc_ref[...] + bias_ref[...], act)
        o_ref[...] = y.astype(o_ref.dtype)


def _gemm_stats_kernel(a_ref, b_ref, o_ref, stats_ref, acc_ref):
    @pl.when(pl.program_id(3) == 0)
    def _():
        acc_ref[...] = jnp.zeros_like(acc_ref)

    acc_ref[...] += jnp.dot(a_ref[...], b_ref[...],
                            preferred_element_type=jnp.float32)

    @pl.when(pl.program_id(3) == pl.num_programs(3) - 1)
    def _():
        acc = acc_ref[...]
        o_ref[...] = acc.astype(o_ref.dtype)
        s = jnp.sum(acc, axis=0, keepdims=True)           # (1, tn)
        sq = jnp.sum(acc * acc, axis=0, keepdims=True)    # (1, tn)
        stats_ref[...] = jnp.concatenate([s, sq], axis=0)  # (2, tn)


def _affine_act_kernel(x_ref, s_ref, t_ref, o_ref, *, act):
    y = x_ref[...].astype(jnp.float32) * s_ref[...] + t_ref[...]
    o_ref[...] = _apply_act(y, act).astype(o_ref.dtype)


# ----------------------------------------------------------------------------
# Pallas wrappers
# ----------------------------------------------------------------------------
def batched_gemm_bias_act(a, b, bias, act, out_dtype):
    """a:(G,M,K) bf16, b:(G,K,N) bf16, bias:(N,) f32 -> act(a@b+bias),
    padded shape (G, Mp, Np) in `out_dtype`."""
    G, M, K = a.shape
    N = b.shape[-1]
    Mp, Kp, Np, tm, tk, tn = _tile_dims(M, K, N, G)
    a = _pad_to(a, (G, Mp, Kp))
    b = _pad_to(b, (G, Kp, Np))
    bias = _pad_to(bias.astype(jnp.float32), (Np,)).reshape(1, Np)

    return pl.pallas_call(
        functools.partial(_gemm_bias_act_kernel, act=act),
        out_shape=jax.ShapeDtypeStruct((G, Mp, Np), out_dtype),
        grid_spec=pltpu.PrefetchScalarGridSpec(
            num_scalar_prefetch=0,
            grid=(G, Mp // tm, Np // tn, Kp // tk),
            in_specs=[
                pl.BlockSpec((None, tm, tk), lambda g, i, j, k: (g, i, k)),
                pl.BlockSpec((None, tk, tn), lambda g, i, j, k: (g, k, j)),
                pl.BlockSpec((1, tn), lambda g, i, j, k: (0, j)),
            ],
            out_specs=pl.BlockSpec((None, tm, tn), lambda g, i, j, k: (g, i, j)),
            scratch_shapes=[pltpu.VMEM((tm, tn), jnp.float32)],
        ),
        compiler_params=pltpu.CompilerParams(
            dimension_semantics=("parallel", "parallel", "parallel", "arbitrary"),
            vmem_limit_bytes=_VMEM_LIMIT),
    )(a, b, bias)


def batched_gemm_stats(a, b, out_dtype):
    """a:(G,M,K) bf16, b:(G,K,N) bf16 -> (y:(G,Mp,Np) out_dtype, sum_c, sumsq_c).
    Padded rows of `a` are zero so they contribute nothing to the stats, which
    are taken from the f32 accumulator in-kernel (exact)."""
    G, M, K = a.shape
    N = b.shape[-1]
    Mp, Kp, Np, tm, tk, tn = _tile_dims(M, K, N, G)
    a = _pad_to(a, (G, Mp, Kp))
    b = _pad_to(b, (G, Kp, Np))
    n_i = Mp // tm

    y, stats = pl.pallas_call(
        _gemm_stats_kernel,
        out_shape=(jax.ShapeDtypeStruct((G, Mp, Np), out_dtype),
                   jax.ShapeDtypeStruct((G * n_i, 2, Np), jnp.float32)),
        grid_spec=pltpu.PrefetchScalarGridSpec(
            num_scalar_prefetch=0,
            grid=(G, n_i, Np // tn, Kp // tk),
            in_specs=[
                pl.BlockSpec((None, tm, tk), lambda g, i, j, k: (g, i, k)),
                pl.BlockSpec((None, tk, tn), lambda g, i, j, k: (g, k, j)),
            ],
            out_specs=[
                pl.BlockSpec((None, tm, tn), lambda g, i, j, k: (g, i, j)),
                pl.BlockSpec((None, 2, tn),
                             lambda g, i, j, k: (g * n_i + i, 0, j)),
            ],
            scratch_shapes=[pltpu.VMEM((tm, tn), jnp.float32)],
        ),
        compiler_params=pltpu.CompilerParams(
            dimension_semantics=("parallel", "parallel", "parallel", "arbitrary"),
            vmem_limit_bytes=_VMEM_LIMIT),
    )(a, b)
    sum_c = stats[:, 0, :].sum(axis=0)
    sumsq_c = stats[:, 1, :].sum(axis=0)
    return y, sum_c, sumsq_c


def affine_act(x, scale, shift, act, out_dtype):
    """x:(R,Cp) bf16 (Cp multiple of 128): per-channel act(x*scale + shift)."""
    R, Cp = x.shape
    tr = min(1024, _round_up(R, 16))
    Rp = _round_up(R, tr)
    x = _pad_to(x, (Rp, Cp))

    out = pl.pallas_call(
        functools.partial(_affine_act_kernel, act=act),
        out_shape=jax.ShapeDtypeStruct((Rp, Cp), out_dtype),
        grid_spec=pltpu.PrefetchScalarGridSpec(
            num_scalar_prefetch=0,
            grid=(Rp // tr,),
            in_specs=[
                pl.BlockSpec((tr, Cp), lambda i: (i, 0)),
                pl.BlockSpec((1, Cp), lambda i: (0, 0)),
                pl.BlockSpec((1, Cp), lambda i: (0, 0)),
            ],
            out_specs=pl.BlockSpec((tr, Cp), lambda i: (i, 0)),
        ),
        compiler_params=pltpu.CompilerParams(
            dimension_semantics=("parallel",),
            vmem_limit_bytes=_VMEM_LIMIT),
    )(x, scale.reshape(1, Cp), shift.reshape(1, Cp))
    return out[:R]


# ----------------------------------------------------------------------------
# Convolution -> GEMM lowering (XLA glue)
# ----------------------------------------------------------------------------
# TODO(synk): generate these taps inside the kernel from a halo'd VMEM tile
# (x via memory_space=pl.ANY + make_async_copy) to avoid the im2col HBM pass.
def _conv_down_gemm(x, w, cast=jnp.bfloat16):
    """x NHWC, w (Cout, Cin, 4, 4) PyTorch Conv2d layout. k=4, s=2, p=1."""
    N, H, W, C = x.shape
    Cout = w.shape[0]
    Ho, Wo = H // 2, W // 2
    Cp = _round_up(C, 8)                      # 16*Cp is a multiple of 128
    x = _pad_to(x, (N, H, W, Cp)).astype(cast)
    xp = jnp.pad(x, ((0, 0), (1, 1), (1, 1), (0, 0)))
    taps = []
    for kh in range(4):
        for kw in range(4):
            taps.append(xp[:, kh:kh + 2 * Ho:2, kw:kw + 2 * Wo:2, :])
    a = jnp.concatenate(taps, axis=-1).reshape(1, N * Ho * Wo, 16 * Cp)
    wt = _pad_to(jnp.transpose(w, (2, 3, 1, 0)), (4, 4, Cp, Cout))
    b = wt.reshape(1, 16 * Cp, Cout).astype(cast)
    return a, b, (N, Ho, Wo, Cout)


def _up_slices(parity, L):
    # Output index 2m+parity draws input rows {m-1, m} (parity 0, kernel taps
    # 3,1) or {m, m+1} (parity 1, kernel taps 2,0); +1 offset for the zero pad.
    if parity == 0:
        return (slice(0, L), slice(1, L + 1))
    return (slice(1, L + 1), slice(2, L + 2))


_KTAP = {0: (3, 1), 1: (2, 0)}


def _conv_up_gemm(x, w, cast=jnp.bfloat16):
    """x NHWC, w (Cin, Cout, 4, 4) PyTorch ConvTranspose2d layout.
    Parity decomposition: 4 stride-1 2x2 sub-convs, one per output parity."""
    N, H, W, C = x.shape
    Cout = w.shape[1]
    Cp = _round_up(C, 32)                     # 4*Cp is a multiple of 128
    x = _pad_to(x, (N, H, W, Cp)).astype(cast)
    xp = jnp.pad(x, ((0, 0), (1, 1), (1, 1), (0, 0)))
    wp = _pad_to(w, (Cp, Cout, 4, 4))

    a_parts, b_parts = [], []
    for ph in range(2):
        for pw in range(2):
            taps, wsub = [], []
            for rt in range(2):
                for ct in range(2):
                    rs = _up_slices(ph, H)[rt]
                    cs = _up_slices(pw, W)[ct]
                    taps.append(xp[:, rs, cs, :])
                    wsub.append(wp[:, :, _KTAP[ph][rt], _KTAP[pw][ct]])
            a_parts.append(jnp.concatenate(taps, axis=-1)
                           .reshape(N * H * W, 4 * Cp))
            b_parts.append(jnp.stack(wsub, axis=0).reshape(4 * Cp, Cout))
    a = jnp.stack(a_parts, axis=0)                       # (4, M, 4*Cp) bf16
    b = jnp.stack(b_parts, axis=0).astype(cast)          # (4, 4*Cp, Cout)
    return a, b, (N, 2 * H, 2 * W, Cout)


def _bn_scale_shift(sum_c, sumsq_c, count, gamma, beta, eps=1e-5):
    mean = sum_c / count
    var = jnp.maximum(sumsq_c / count - mean * mean, 0.0)   # biased variance
    scale = gamma / jnp.sqrt(var + eps)
    return scale, beta - mean * scale


def conv_layer(x, w, b, *, act, bn=None, transposed=False,
               out_dtype=jnp.bfloat16):
    if transposed:
        a, bm, meta = _conv_up_gemm(x, w)
    else:
        a, bm, meta = _conv_down_gemm(x, w)
    N, Ho, Wo, Cout = meta
    G, M, _ = a.shape

    if bn is None:
        # conv bias + activation fused into the GEMM epilogue (single pass).
        y = batched_gemm_bias_act(a, bm, b, act, out_dtype)
    else:
        # Training-mode BatchNorm: the conv bias cancels exactly against the
        # batch-mean subtraction, so it is dropped (not applied).
        gamma, beta = bn
        y, s, sq = batched_gemm_stats(a, bm, jnp.bfloat16)
        Np = y.shape[-1]
        count = float(G * M)                      # = N * Ho * Wo
        scale, shift = _bn_scale_shift(s[:Cout], sq[:Cout], count, gamma, beta)
        scale = _pad_to(scale, (Np,))
        shift = _pad_to(shift, (Np,))
        # TODO(synk): fold this affine+act into the next layer's tap build to
        # drop one activation-sized HBM round trip per BN layer.
        y = affine_act(y.reshape(G * y.shape[1], Np), scale, shift, act,
                       out_dtype)
        y = y.reshape(G, -1, Np)

    y = y[:, :M, :Cout]                           # drop tile padding
    if transposed:
        # TODO(synk): write the grouped GEMM out in an interleave-friendly
        # layout so this parity re-assembly is a cheap reshape.
        H2, W2 = Ho // 2, Wo // 2
        y = y.reshape(2, 2, N, H2, W2, Cout)
        y = jnp.transpose(y, (2, 3, 0, 4, 1, 5)).reshape(N, Ho, Wo, Cout)
    else:
        y = y.reshape(N, Ho, Wo, Cout)
    return y


# ----------------------------------------------------------------------------
# Generator parameters + forward
# ----------------------------------------------------------------------------
def init_params(key, in_ch=3, out_ch=3):
    def conv_w(k, shape):
        return 0.02 * jax.random.normal(k, shape, jnp.float32)

    keys = jax.random.split(key, 10)
    p = {}
    # encoders: Conv2d weight layout (Cout, Cin, 4, 4)
    enc_dims = [(in_ch, 64), (64, 128), (128, 256), (256, 512), (512, 512)]
    for i, (ci, co) in enumerate(enc_dims, start=1):
        p[f"enc{i}"] = (conv_w(keys[i - 1], (co, ci, 4, 4)),
                        jnp.zeros((co,), jnp.float32))
    # decoders: ConvTranspose2d weight layout (Cin, Cout, 4, 4)
    dec_dims = [(512, 512), (1024, 256), (512, 128), (256, 64), (128, out_ch)]
    for i, (ci, co) in enumerate(dec_dims, start=1):
        p[f"dec{i}"] = (conv_w(keys[4 + i], (ci, co, 4, 4)),
                        jnp.zeros((co,), jnp.float32))
    # batch norms: default init gamma=1, beta=0
    for name, c in [("bn_enc2", 128), ("bn_enc3", 256), ("bn_enc4", 512),
                    ("bn_enc5", 512), ("bn_dec1", 512), ("bn_dec2", 256),
                    ("bn_dec3", 128), ("bn_dec4", 64)]:
        p[name] = (jnp.ones((c,), jnp.float32), jnp.zeros((c,), jnp.float32))
    return p


def generator_forward(params, compressed_img_nchw):
    x = jnp.transpose(compressed_img_nchw, (0, 2, 3, 1))   # NCHW -> NHWC

    e1 = conv_layer(x,  *params["enc1"], act="leaky_relu")
    e2 = conv_layer(e1, *params["enc2"], act="leaky_relu", bn=params["bn_enc2"])
    e3 = conv_layer(e2, *params["enc3"], act="leaky_relu", bn=params["bn_enc3"])
    e4 = conv_layer(e3, *params["enc4"], act="leaky_relu", bn=params["bn_enc4"])
    e5 = conv_layer(e4, *params["enc5"], act="leaky_relu", bn=params["bn_enc5"])

    d1 = conv_layer(e5, *params["dec1"], act="relu", bn=params["bn_dec1"],
                    transposed=True)
    d1 = jnp.concatenate([d1, e4], axis=-1)   # torch.cat(dim=1) == channel axis
    d2 = conv_layer(d1, *params["dec2"], act="relu", bn=params["bn_dec2"],
                    transposed=True)
    d2 = jnp.concatenate([d2, e3], axis=-1)
    d3 = conv_layer(d2, *params["dec3"], act="relu", bn=params["bn_dec3"],
                    transposed=True)
    d3 = jnp.concatenate([d3, e2], axis=-1)
    d4 = conv_layer(d3, *params["dec4"], act="relu", bn=params["bn_dec4"],
                    transposed=True)
    d4 = jnp.concatenate([d4, e1], axis=-1)

    out = conv_layer(d4, *params["dec5"], act="tanh", transposed=True,
                     out_dtype=jnp.float32)
    return jnp.transpose(out, (0, 3, 1, 2))                 # NHWC -> NCHW


if __name__ == "__main__":
    key = jax.random.PRNGKey(0)
    k_params, k_in, k_x, k_wd, k_bd, k_wu, k_bu = jax.random.split(key, 7)

    # --- unit checks: conv / conv-transpose GEMM lowering vs lax reference ---
    xt = jax.random.normal(k_x, (2, 16, 16, 6), jnp.float32)
    wd = 0.1 * jax.random.normal(k_wd, (16, 6, 4, 4), jnp.float32)
    bd = 0.1 * jax.random.normal(k_bd, (16,), jnp.float32)
    y_pl = conv_layer(xt, wd, bd, act=None, out_dtype=jnp.float32)
    y_ref = lax.conv_general_dilated(
        xt, jnp.transpose(wd, (2, 3, 1, 0)), (2, 2), ((1, 1), (1, 1)),
        dimension_numbers=("NHWC", "HWIO", "NHWC")) + bd
    assert y_pl.shape == y_ref.shape, (y_pl.shape, y_ref.shape)
    err_down = float(jnp.max(jnp.abs(y_pl - y_ref)))
    assert err_down < 0.1, err_down          # bf16 operands -> loose tolerance

    wu = 0.1 * jax.random.normal(k_wu, (6, 16, 4, 4), jnp.float32)
    bu = 0.1 * jax.random.normal(k_bu, (16,), jnp.float32)
    y_pl = conv_layer(xt, wu, bu, act=None, transposed=True,
                      out_dtype=jnp.float32)
    y_ref = lax.conv_general_dilated(
        xt, jnp.transpose(wu[:, :, ::-1, ::-1], (2, 3, 0, 1)), (1, 1),
        ((2, 2), (2, 2)), lhs_dilation=(2, 2),
        dimension_numbers=("NHWC", "HWIO", "NHWC")) + bu
    assert y_pl.shape == y_ref.shape, (y_pl.shape, y_ref.shape)
    err_up = float(jnp.max(jnp.abs(y_pl - y_ref)))
    assert err_up < 0.1, err_up

    # --- full generator forward ---
    params = init_params(k_params, in_ch=3, out_ch=3)
    # 2^5 downsamples -> use 32x32 so the bottleneck is 1x1.
    x = jax.random.normal(k_in, (2, 3, 32, 32), jnp.float32)

    fwd = jax.jit(generator_forward)
    out = jax.block_until_ready(fwd(params, x))

    assert out.shape == (2, 3, 32, 32), out.shape
    assert bool(jnp.all(jnp.isfinite(out)))
    assert bool(jnp.all(jnp.abs(out) <= 1.0))  # tanh output range
    print("KERNEL_OK")
</pallas_src>

<mosaic_0001>
module attributes {stable_mosaic.version = 11 : i64} {
  func.func @_gemm_bias_act_kernel(%arg0: i32, %arg1: i32, %arg2: i32, %arg3: i32, %arg4: memref<1x128x128xbf16, #tpu.memory_space<vmem>>, %arg5: memref<1x128x128xbf16, #tpu.memory_space<vmem>>, %arg6: memref<1x128xf32, #tpu.memory_space<vmem>>, %arg7: memref<1x128x128xf32, #tpu.memory_space<vmem>>, %arg8: memref<128x128xf32, #tpu.memory_space<vmem>>) attributes {dimension_semantics = [#tpu.dimension_semantics<parallel>, #tpu.dimension_semantics<parallel>, #tpu.dimension_semantics<parallel>, #tpu.dimension_semantics<arbitrary>], iteration_bounds = array<i64: 1, 1, 1, 1>, scalar_prefetch = 0 : i64, scratch_operands = 1 : i64, tpu.core_type = #tpu.core_type<tc>, window_params = [{transform_indices = @transform_0, window_bounds = array<i64: 1, 128, 128>}, {transform_indices = @transform_1, window_bounds = array<i64: 1, 128, 128>}, {transform_indices = @transform_2, window_bounds = array<i64: 1, 128>}, {transform_indices = @transform_3, window_bounds = array<i64: 1, 128, 128>}]} {
    %c0_i32 = arith.constant 0 : i32
    %0 = arith.cmpi eq, %arg3, %c0_i32 : i32
    %1 = arith.extui %0 : i1 to i32
    %c0_i32_0 = arith.constant 0 : i32
    %2 = arith.cmpi ne, %1, %c0_i32_0 : i32
    scf.if %2 {
      %cst_12 = arith.constant 0.000000e+00 : f32
      %14 = vector.broadcast %cst_12 : f32 to vector<128x128xf32>
      %c0_13 = arith.constant 0 : index
      %c0_14 = arith.constant 0 : index
      %15 = vector.load %arg8[%c0_13, %c0_14] : memref<128x128xf32, #tpu.memory_space<vmem>>, vector<128x128xf32>
      tpu.vector_store %arg8[%c0_13, %c0_14], %14 {strides = array<i32>} : memref<128x128xf32, #tpu.memory_space<vmem>>, vector<128x128xf32>,
    } else {
    }
    %c0 = arith.constant 0 : index
    %c0_1 = arith.constant 0 : index
    %3 = vector.load %arg8[%c0, %c0_1] : memref<128x128xf32, #tpu.memory_space<vmem>>, vector<128x128xf32>
    %c0_2 = arith.constant 0 : index
    %c0_3 = arith.constant 0 : index
    %c0_4 = arith.constant 0 : index
    %4 = vector.load %arg4[%c0_2, %c0_3, %c0_4] : memref<1x128x128xbf16, #tpu.memory_space<vmem>>, vector<1x128x128xbf16>
    %5 = vector.shape_cast %4 : vector<1x128x128xbf16> to vector<128x128xbf16>
    %c0_5 = arith.constant 0 : index
    %c0_6 = arith.constant 0 : index
    %c0_7 = arith.constant 0 : index
    %6 = vector.load %arg5[%c0_5, %c0_6, %c0_7] : memref<1x128x128xbf16, #tpu.memory_space<vmem>>, vector<1x128x128xbf16>
    %7 = vector.shape_cast %6 : vector<1x128x128xbf16> to vector<128x128xbf16>
    %cst = arith.constant dense<0.000000e+00> : vector<128x128xf32>
    %8 = tpu.matmul %5, %7, %cst {dimension_numbers = #tpu.dot_dimension_numbers<[1], [0], [0], [1], [0, 0, 1, 1], [], []>} : vector<128x128xbf16>, vector<128x128xbf16>, vector<128x128xf32> -> vector<128x128xf32>
    %9 = arith.addf %3, %8 : vector<128x128xf32>
    %c0_8 = arith.constant 0 : index
    %c0_9 = arith.constant 0 : index
    %10 = vector.load %arg8[%c0_8, %c0_9] : memref<128x128xf32, #tpu.memory_space<vmem>>, vector<128x128xf32>
    tpu.vector_store %arg8[%c0_8, %c0_9], %9 {strides = array<i32>} : memref<128x128xf32, #tpu.memory_space<vmem>>, vector<128x128xf32>,
    %c0_i32_10 = arith.constant 0 : i32
    %11 = arith.cmpi eq, %arg3, %c0_i32_10 : i32
    %12 = arith.extui %11 : i1 to i32
    %c0_i32_11 = arith.constant 0 : i32
    %13 = arith.cmpi ne, %12, %c0_i32_11 : i32
    scf.if %13 {
      %c0_12 = arith.constant 0 : index
      %c0_13 = arith.constant 0 : index
      %14 = vector.load %arg8[%c0_12, %c0_13] : memref<128x128xf32, #tpu.memory_space<vmem>>, vector<128x128xf32>
      %c0_14 = arith.constant 0 : index
      %c0_15 = arith.constant 0 : index
      %15 = vector.load %arg6[%c0_14, %c0_15] : memref<1x128xf32, #tpu.memory_space<vmem>>, vector<1x128xf32>
      %16 = vector.broadcast %15 : vector<1x128xf32> to vector<128x128xf32>
      %17 = arith.addf %14, %16 : vector<128x128xf32>
      %c0_16 = arith.constant 0 : index
      %c0_17 = arith.constant 0 : index
      %c0_18 = arith.constant 0 : index
      %18 = vector.load %arg7[%c0_16, %c0_17, %c0_18] : memref<1x128x128xf32, #tpu.memory_space<vmem>>, vector<1x128x128xf32>
      %19 = vector.shape_cast %18 : vector<1x128x128xf32> to vector<128x128xf32>
      %20 = vector.shape_cast %17 : vector<128x128xf32> to vector<1x128x128xf32>
      tpu.vector_store %arg7[%c0_16, %c0_17, %c0_18], %20 {strides = array<i32>} : memref<1x128x128xf32, #tpu.memory_space<vmem>>, vector<1x128x128xf32>,
    } else {
    }
    return
  }
  func.func @transform_0(%arg0: i32, %arg1: i32, %arg2: i32, %arg3: i32) -> (i32, i32, i32) {
    %c0_i32 = arith.constant 0 : i32
    return %arg0, %arg1, %arg3 : i32, i32, i32
  }
  func.func @transform_1(%arg0: i32, %arg1: i32, %arg2: i32, %arg3: i32) -> (i32, i32, i32) {
    %c0_i32 = arith.constant 0 : i32
    return %arg0, %arg3, %arg2 : i32, i32, i32
  }
  func.func @transform_2(%arg0: i32, %arg1: i32, %arg2: i32, %arg3: i32) -> (i32, i32) {
    %c0_i32 = arith.constant 0 : i32
    %c0_i32_0 = arith.constant 0 : i32
    return %c0_i32, %arg2 : i32, i32
  }
  func.func @transform_3(%arg0: i32, %arg1: i32, %arg2: i32, %arg3: i32) -> (i32, i32, i32) {
    %c0_i32 = arith.constant 0 : i32
    return %arg0, %arg1, %arg2 : i32, i32, i32
  }
}

</mosaic_0001>

<bundles_post_ra>
// kernel: tpu_custom_call.1
= control target key start
LH: loop header
LB: loop body
LE: loop exit
PB: predicated region body
PF: predicated region fallthrough
CT: control target
= control target key end

     0   :  { %8 = vsyncpa [#allocation4], 0  ;;  %s596_s0 = inlined_call_operand.hbm [shape: bf16[1,128,128], index: 0, kind: input, shape index: {}]   ;;  %s597_s1 = inlined_call_operand.hbm [shape: bf16[1,128,128], index: 1, kind: input, shape index: {}]   ;;  %s598_s2 = inlined_call_operand.vmem [shape: f32[1,128], index: 2, kind: input, shape index: {}]   ;;  %s599_s3 = inlined_call_operand.hbm [shape: f32[1,128,128], index: 3, kind: output, shape index: {}]  }
   0x1   :  { %9 = vsyncpa [#allocation7], 0 }
   0x2   :  { %10 = vsyncpa [#allocation5], 0  ;;  %s15_s14 = sshll.u32 %s596_s0, 4  ;;  %s557_s15 = smov [#allocation3]   ;;  %s16_s14 = int_to_ptr.hbm [resolvable:$true] %s15_s14 }
   0x3   :  { %s17_s16 = sshll.u32 %s557_s15, 4  ;;  %s28_s19 = sshll.u32 %s597_s1, 4  ;;  %s18_s16 = int_to_ptr.vmem [resolvable:$true] %s17_s16  ;;  %s29_s19 = int_to_ptr.hbm [resolvable:$true] %s28_s19 }
   0x4   :  { %s558_s20 = smov 64   ;;  %s559_s21 = smov 4  }
   0x5   :  { %23 = dma.hbm_to_vmem [thread:$0]  %s16_s14, 1024, %s18_s16, [#allocation4], %s558_s20, %s558_s20, %s559_s21  }
   0x6   :  { %s560_s22 = smov [#allocation6]  }
   0x7   :  { %s30_s23 = sshll.u32 %s560_s22, 4  ;;  %s31_s23 = int_to_ptr.vmem [resolvable:$true] %s30_s23 }
   0x8   :  { %36 = dma.hbm_to_vmem [thread:$0]  %s29_s19, 1024, %s31_s23, [#allocation7], %s558_s20, %s558_s20, %s559_s21  }
   0x9   :  { %551 = dma.done.wait [#allocation4], 1024  }
   0xa   :  { %552 = vsyncadd [#allocation4], 4294966272 }
   0xb   :  { %553 = dma.done.wait [#allocation7], 1024  }
   0xc   :  { %554 = vsyncadd [#allocation7], 4294966272  ;;  %v446_v0 = vld [vmem:[#allocation6 + $0x38] sm:$0xff]  ;;  %v445_v1 = vld [vmem:[#allocation6 + $0x30] sm:$0xff]  ;;  %s353_s27 = sshll.u32 %s599_s3, 4  ;;  %s562_s28 = smov 128   ;;  %s354_s27 = int_to_ptr.hbm [resolvable:$true] %s353_s27 }
   0xd   :  { %211 = vmatpush.bf16.msra.mxu0 %v446_v0  ;;  %447 = vmatpush.bf16.msra.mxu1 %v446_v0  ;;  %v444_v2 = vld [vmem:[#allocation6 + $0x28] sm:$0xff]  ;;  %v443_v3 = vld [vmem:[#allocation6 + $0x20] sm:$0xff]  ;;  %v442_v4 = vld [vmem:[#allocation6 + $0x18] sm:$0xff]  ;;  %s563_s29 = smov 8  }
   0xe   :  { %448 = vmatpush.bf16.msra.mxu2 %v446_v0  ;;  %449 = vmatpush.bf16.msra.mxu3 %v446_v0  ;;  %v441_v5 = vld [vmem:[#allocation6 + $0x10] sm:$0xff]  ;;  %v440_v6 = vld [vmem:[#allocation6 + $0x8] sm:$0xff]  ;;  %v439_v7 = vld [vmem:[#allocation6] sm:$0xff] }
   0xf   :  { %v431_v8 = vld [vmem:[#allocation3] sm:$0xff]  ;;  %v433_v9 = vld [vmem:[#allocation3 + $0x10] sm:$0xff]  ;;  %v432_v12 = vld [vmem:[#allocation3 + $0x8] sm:$0xff] }
  0x10   :  { %v435_v10 = vld [vmem:[#allocation3 + $0x20] sm:$0xff]  ;;  %v437_v11 = vld [vmem:[#allocation3 + $0x30] sm:$0xff]  ;;  %v434_v13 = vld [vmem:[#allocation3 + $0x18] sm:$0xff] }
  0x11   :  { %212 = vmatpush.bf16.msra.mxu0 %v445_v1  ;;  %450 = vmatpush.bf16.msra.mxu1 %v445_v1  ;;  %v436_v14 = vld [vmem:[#allocation3 + $0x28] sm:$0xff]  ;;  %v438_v15 = vld [vmem:[#allocation3 + $0x38] sm:$0xff]  ;;  %v478_v16 = vld [vmem:[%s598_s2] ss:$0 sm:$0xff]  ;;  %s561_s2 = smov [#allocation8]  }
  0x12   :  { %451 = vmatpush.bf16.msra.mxu2 %v445_v1  ;;  %452 = vmatpush.bf16.msra.mxu3 %v445_v1  ;;  %s351_s24 = sshll.u32 %s561_s2, 4  ;;  %s352_s24 = int_to_ptr.vmem [resolvable:$true] %s351_s24 }
  0x15   :  { %213 = vmatpush.bf16.msra.mxu0 %v444_v2  ;;  %453 = vmatpush.bf16.msra.mxu1 %v444_v2 }
  0x16   :  { %454 = vmatpush.bf16.msra.mxu2 %v444_v2  ;;  %455 = vmatpush.bf16.msra.mxu3 %v444_v2 }
  0x19   :  { %214 = vmatpush.bf16.msra.mxu0 %v443_v3  ;;  %456 = vmatpush.bf16.msra.mxu1 %v443_v3 }
  0x1a   :  { %457 = vmatpush.bf16.msra.mxu2 %v443_v3  ;;  %458 = vmatpush.bf16.msra.mxu3 %v443_v3 }
  0x1d   :  { %215 = vmatpush.bf16.msra.mxu0 %v442_v4  ;;  %459 = vmatpush.bf16.msra.mxu1 %v442_v4 }
  0x1e   :  { %460 = vmatpush.bf16.msra.mxu2 %v442_v4  ;;  %461 = vmatpush.bf16.msra.mxu3 %v442_v4 }
  0x21   :  { %216 = vmatpush.bf16.msra.mxu0 %v441_v5  ;;  %462 = vmatpush.bf16.msra.mxu1 %v441_v5 }
  0x22   :  { %463 = vmatpush.bf16.msra.mxu2 %v441_v5  ;;  %464 = vmatpush.bf16.msra.mxu3 %v441_v5 }
  0x25   :  { %217 = vmatpush.bf16.msra.mxu0 %v440_v6  ;;  %465 = vmatpush.bf16.msra.mxu1 %v440_v6 }
  0x26   :  { %466 = vmatpush.bf16.msra.mxu2 %v440_v6  ;;  %467 = vmatpush.bf16.msra.mxu3 %v440_v6 }
  0x29   :  { %218 = vmatpush.bf16.msra.mxu0 %v439_v7  ;;  %468 = vmatpush.bf16.msra.mxu1 %v439_v7 }
  0x2a   :  { %469 = vmatpush.bf16.msra.mxu2 %v439_v7  ;;  %470 = vmatpush.bf16.msra.mxu3 %v439_v7 }
  0x2c   :  { %219 = vmatmul.bf16.vlgmr.msra.gmra.mxu0 %v431_v8  ;;  %229 = vmatmul.bf16.vlgmr.msra.gmra.mxu1 %v433_v9 }
  0x2d   :  { %239 = vmatmul.bf16.vlgmr.msra.gmra.mxu2 %v435_v10  ;;  %249 = vmatmul.bf16.vlgmr.msra.gmra.mxu3 %v437_v11 }
  0x3c   :  { %224 = vmatmul.bf16.gmra.mxu0 %v432_v12  ;;  %234 = vmatmul.bf16.gmra.mxu1 %v434_v13 }
  0x3d   :  { %244 = vmatmul.bf16.gmra.mxu2 %v436_v14  ;;  %254 = vmatmul.bf16.gmra.mxu3 %v438_v15 }
  0xa9   :  { %v220_v17 = vpop.f32.mrf.mxu0  ;;  %v230_v18 = vpop.f32.mrf.mxu1 }
  0xaa   :  { %v315_v19 = vadd.f32 %v478_v16, %v220_v17  ;;  %v319_v20 = vadd.f32 %v478_v16, %v230_v18 }
  0xac   :  { %331 = vst [vmem:[#allocation8] sm:$0xff] %v315_v19 }
  0xad   :  { %335 = vst [vmem:[#allocation8 + $0x20] sm:$0xff] %v319_v20 }
  0xb0   :  { %v240_v21 = vpop.f32.mrf.mxu2  ;;  %v250_v22 = vpop.f32.mrf.mxu3 }
  0xb1   :  { %v323_v23 = vadd.f32 %v478_v16, %v240_v21  ;;  %v327_v24 = vadd.f32 %v478_v16, %v250_v22  ;;  %v222_v25 = vpop.f32.mrf.mxu0  ;;  %v232_v26 = vpop.f32.mrf.mxu1 }
  0xb2   :  { %v316_v27 = vadd.f32 %v478_v16, %v222_v25  ;;  %v320_v28 = vadd.f32 %v478_v16, %v232_v26 }
  0xb3   :  { %339 = vst [vmem:[#allocation8 + $0x40] sm:$0xff] %v323_v23 }
  0xb4   :  { %343 = vst [vmem:[#allocation8 + $0x60] sm:$0xff] %v327_v24 }
  0xb5   :  { %332 = vst [vmem:[#allocation8 + $0x8] sm:$0xff] %v316_v27 }
  0xb6   :  { %336 = vst [vmem:[#allocation8 + $0x28] sm:$0xff] %v320_v28 }
  0xb8   :  { %v242_v29 = vpop.f32.mrf.mxu2  ;;  %v252_v30 = vpop.f32.mrf.mxu3 }
  0xb9   :  { %v324_v31 = vadd.f32 %v478_v16, %v242_v29  ;;  %v328_v32 = vadd.f32 %v478_v16, %v252_v30  ;;  %v225_v33 = vpop.f32.mrf.mxu0  ;;  %v235_v34 = vpop.f32.mrf.mxu1 }
  0xba   :  { %v317_v35 = vadd.f32 %v478_v16, %v225_v33  ;;  %v321_v36 = vadd.f32 %v478_v16, %v235_v34 }
  0xbb   :  { %340 = vst [vmem:[#allocation8 + $0x48] sm:$0xff] %v324_v31 }
  0xbc   :  { %344 = vst [vmem:[#allocation8 + $0x68] sm:$0xff] %v328_v32 }
  0xbd   :  { %333 = vst [vmem:[#allocation8 + $0x10] sm:$0xff] %v317_v35 }
  0xbe   :  { %337 = vst [vmem:[#allocation8 + $0x30] sm:$0xff] %v321_v36 }
  0xc0   :  { %v245_v37 = vpop.f32.mrf.mxu2  ;;  %v255_v38 = vpop.f32.mrf.mxu3 }
  0xc1   :  { %v325_v39 = vadd.f32 %v478_v16, %v245_v37  ;;  %v329_v40 = vadd.f32 %v478_v16, %v255_v38  ;;  %v227_v41 = vpop.f32.mrf.mxu0  ;;  %v237_v42 = vpop.f32.mrf.mxu1 }
  0xc2   :  { %v318_v43 = vadd.f32 %v478_v16, %v227_v41  ;;  %v322_v44 = vadd.f32 %v478_v16, %v237_v42 }
  0xc3   :  { %341 = vst [vmem:[#allocation8 + $0x50] sm:$0xff] %v325_v39 }
  0xc4   :  { %345 = vst [vmem:[#allocation8 + $0x70] sm:$0xff] %v329_v40 }
  0xc5   :  { %334 = vst [vmem:[#allocation8 + $0x18] sm:$0xff] %v318_v43 }
  0xc6   :  { %338 = vst [vmem:[#allocation8 + $0x38] sm:$0xff] %v322_v44 }
  0xc8   :  { %v247_v45 = vpop.f32.mrf.mxu2  ;;  %v257_v46 = vpop.f32.mrf.mxu3 }
  0xc9   :  { %v326_v47 = vadd.f32 %v478_v16, %v247_v45  ;;  %v330_v48 = vadd.f32 %v478_v16, %v257_v46 }
  0xcb   :  { %342 = vst [vmem:[#allocation8 + $0x58] sm:$0xff] %v326_v47 }
  0xcc   :  { %346 = vst [vmem:[#allocation8 + $0x78] sm:$0xff] %v330_v48 }
  0xcd   :  { %359 = dma.vmem_to_hbm [thread:$0]  %s352_s24, 2048, %s354_s27, [#allocation5], %s562_s28, %s562_s28, %s563_s29  }
  0xce   :  { %555 = dma.done.wait [#allocation5], 2048  }
  0xcf   :  { %556 = vsyncadd [#allocation5], 4294965248 }
  0xd0   :  { %364 = vsyncpa [#allocation4], 1 }
  0xd1   :  { %365 = vsyncpa [#allocation7], 1 }
  0xd2   :  { %366 = vsyncpa [#allocation5], 1 }

</bundles_post_ra>
